<compile_context>
chip_gen: v7x
topology: tpu7x:2x2x1
jax: 0.10.0
libtpu: 0.0.40
codegen_flags: <defaults>
</compile_context>

<pallas_src>
import functools

import jax
import jax.numpy as jnp
from jax.experimental import pallas as pl
from jax.experimental.pallas import tpu as pltpu


# ----------------------------------------------------------------------------
# Fused Pallas kernel: all layers + fc in one body
# ----------------------------------------------------------------------------
def _lstmnet_kernel(num_layers, x_ref, h_ref, c_ref, *refs):
    """Fused LSTMnet forward.

    x_ref      : (B, Din)               input
    h_ref/c_ref: (L, B, H)              initial hidden / cell states
    refs       : L * (w_ih:(Din_l,4H), w_hh:(H,4H), b:(1,4H)),
                 fc_w:(H,O), fc_b:(1,O),
                 out:(B,O), h_out:(L,B,H), c_out:(L,B,H)
    Gate order in the fused 4H axis: [i, f, g, o].
    """
    cell_refs = refs[: 3 * num_layers]
    fc_w_ref = refs[3 * num_layers]
    fc_b_ref = refs[3 * num_layers + 1]
    out_ref, h_out_ref, c_out_ref = refs[3 * num_layers + 2:]

    H = h_ref.shape[2]

    x = x_ref[...]
    h_new = None
    c_new = None

    for i in range(num_layers):
        w_ih = cell_refs[3 * i][...]
        w_hh = cell_refs[3 * i + 1][...]
        b = cell_refs[3 * i + 2][...]

        if i == 0:
            x_in = x
            h_prev = h_ref[0]
            c_prev = c_ref[0]
        else:
            # Reference quirk: layer i>0 consumes the FRESH H[i-1] as both
            # input and hidden, and the FRESH C[i-1] as the cell state.
            x_in = h_new
            h_prev = h_new
            c_prev = c_new

        # One fused lane-dense (B, 4H) pre-activation: 2 MXU issues per cell.
        pre = (jnp.dot(x_in, w_ih, preferred_element_type=jnp.float32)
               + jnp.dot(h_prev, w_hh, preferred_element_type=jnp.float32)
               + b)

        i_g = jax.nn.sigmoid(pre[:, 0 * H:1 * H])
        f_g = jax.nn.sigmoid(pre[:, 1 * H:2 * H])
        g_g = jnp.tanh(pre[:, 2 * H:3 * H])
        o_g = jax.nn.sigmoid(pre[:, 3 * H:4 * H])

        c_new = f_g * c_prev + i_g * g_g
        h_new = o_g * jnp.tanh(c_new)

        h_out_ref[i] = h_new
        c_out_ref[i] = c_new

    # Final Linear fused into the same kernel.
    out_ref[...] = (jnp.dot(h_new, fc_w_ref[...],
                            preferred_element_type=jnp.float32)
                    + fc_b_ref[...])


# ----------------------------------------------------------------------------
# Wrapper
# ----------------------------------------------------------------------------
def lstmnet_forward(params, x, H_N, C_N):
    """Mirrors LSTMnet.forward: returns (fc(H[last]), new H list, new C list)."""
    cells = params["cells"]
    num_layers = len(cells)
    B = x.shape[0]
    H = H_N[0].shape[1]
    O = params["fc_w"].shape[1]

    h_stack = jnp.stack(list(H_N), axis=0)
    c_stack = jnp.stack(list(C_N), axis=0)

    flat_weights = []
    for (w_ih, w_hh, b) in cells:
        flat_weights += [w_ih, w_hh, b]

    n_in = 3 + len(flat_weights) + 2
    vmem = pltpu.MemorySpace.VMEM

    out, h_out, c_out = pl.pallas_call(
        functools.partial(_lstmnet_kernel, num_layers),
        out_shape=(
            jax.ShapeDtypeStruct((B, O), jnp.float32),
            jax.ShapeDtypeStruct((num_layers, B, H), jnp.float32),
            jax.ShapeDtypeStruct((num_layers, B, H), jnp.float32),
        ),
        in_specs=[pl.BlockSpec(memory_space=vmem) for _ in range(n_in)],
        out_specs=(pl.BlockSpec(memory_space=vmem),
                   pl.BlockSpec(memory_space=vmem),
                   pl.BlockSpec(memory_space=vmem)),
    )(x, h_stack, c_stack, *flat_weights, params["fc_w"], params["fc_b"])

    return out, [h_out[i] for i in range(num_layers)], \
        [c_out[i] for i in range(num_layers)]


# ----------------------------------------------------------------------------
# Parameter construction (fused gate layout)
# ----------------------------------------------------------------------------
def init_lstmnet_params(key, input_size, hidden_size, num_layers, output_size):
    params = {"cells": []}
    bound = 1.0 / float(jnp.sqrt(hidden_size))
    for layer in range(num_layers):
        d_in = input_size if layer == 0 else hidden_size
        key, k1, k2, k3 = jax.random.split(key, 4)
        w_ih = jax.random.uniform(k1, (d_in, 4 * hidden_size),
                                  jnp.float32, -bound, bound)
        w_hh = jax.random.uniform(k2, (hidden_size, 4 * hidden_size),
                                  jnp.float32, -bound, bound)
        b = jax.random.uniform(k3, (1, 4 * hidden_size),
                               jnp.float32, -bound, bound)
        params["cells"].append((w_ih, w_hh, b))
    # fc: xavier_uniform on (output_size, hidden_size), stored transposed.
    key, kw, kb = jax.random.split(key, 3)
    limit = float(jnp.sqrt(6.0 / (hidden_size + output_size)))
    params["fc_w"] = jax.random.uniform(kw, (hidden_size, output_size),
                                        jnp.float32, -limit, limit)
    params["fc_b"] = jax.random.uniform(kb, (1, output_size), jnp.float32,
                                        -bound, bound)
    return params


# ----------------------------------------------------------------------------
# Pure-JAX reference (for a correctness check)
# ----------------------------------------------------------------------------
def lstmnet_forward_ref(params, x, H_N, C_N):
    H_N = list(H_N)
    C_N = list(C_N)
    Hd = H_N[0].shape[1]
    for i, (w_ih, w_hh, b) in enumerate(params["cells"]):
        if i == 0:
            x_in, h_prev, c_prev = x, H_N[0], C_N[0]
        else:
            x_in, h_prev, c_prev = H_N[i - 1], H_N[i - 1], C_N[i - 1]
        pre = x_in @ w_ih + h_prev @ w_hh + b
        i_g = jax.nn.sigmoid(pre[:, :Hd])
        f_g = jax.nn.sigmoid(pre[:, Hd:2 * Hd])
        g_g = jnp.tanh(pre[:, 2 * Hd:3 * Hd])
        o_g = jax.nn.sigmoid(pre[:, 3 * Hd:])
        C_N[i] = f_g * c_prev + i_g * g_g
        H_N[i] = o_g * jnp.tanh(C_N[i])
    out = H_N[-1] @ params["fc_w"] + params["fc_b"]
    return out, H_N, C_N


# ----------------------------------------------------------------------------
if __name__ == "__main__":
    batch = 8
    input_size = 16
    hidden_size = 32        # 4H = 128 -> one lane-dense vreg per gate block
    num_layers = 3
    output_size = 4

    key = jax.random.PRNGKey(0)
    key, kx, kh, kc = jax.random.split(key, 4)

    params = init_lstmnet_params(key, input_size, hidden_size,
                                 num_layers, output_size)

    x = jax.random.normal(kx, (batch, input_size), jnp.float32)
    H_N = [jax.random.normal(jax.random.fold_in(kh, i),
                             (batch, hidden_size), jnp.float32)
           for i in range(num_layers)]
    C_N = [jax.random.normal(jax.random.fold_in(kc, i),
                             (batch, hidden_size), jnp.float32)
           for i in range(num_layers)]

    out, H_new, C_new = lstmnet_forward(params, x, H_N, C_N)
    out = jax.block_until_ready(out)
    jax.block_until_ready(H_new)
    jax.block_until_ready(C_new)

    # Correctness check against a pure-JAX reference.
    out_ref, H_ref, C_ref = lstmnet_forward_ref(params, x, H_N, C_N)
    assert out.shape == (batch, output_size) and out.dtype == jnp.float32
    assert jnp.allclose(out, out_ref, atol=2e-3, rtol=2e-3)
    for i in range(num_layers):
        assert jnp.allclose(H_new[i], H_ref[i], atol=2e-3, rtol=2e-3)
        assert jnp.allclose(C_new[i], C_ref[i], atol=2e-3, rtol=2e-3)

    print("KERNEL_OK")
</pallas_src>

<mosaic_0001>
module attributes {stable_mosaic.version = 11 : i64} {
  func.func @_lstmnet_kernel(%arg0: memref<8x16xf32, #tpu.memory_space<vmem>>, %arg1: memref<3x8x32xf32, #tpu.memory_space<vmem>>, %arg2: memref<3x8x32xf32, #tpu.memory_space<vmem>>, %arg3: memref<16x128xf32, #tpu.memory_space<vmem>>, %arg4: memref<32x128xf32, #tpu.memory_space<vmem>>, %arg5: memref<1x128xf32, #tpu.memory_space<vmem>>, %arg6: memref<32x128xf32, #tpu.memory_space<vmem>>, %arg7: memref<32x128xf32, #tpu.memory_space<vmem>>, %arg8: memref<1x128xf32, #tpu.memory_space<vmem>>, %arg9: memref<32x128xf32, #tpu.memory_space<vmem>>, %arg10: memref<32x128xf32, #tpu.memory_space<vmem>>, %arg11: memref<1x128xf32, #tpu.memory_space<vmem>>, %arg12: memref<32x4xf32, #tpu.memory_space<vmem>>, %arg13: memref<1x4xf32, #tpu.memory_space<vmem>>, %arg14: memref<8x4xf32, #tpu.memory_space<vmem>>, %arg15: memref<3x8x32xf32, #tpu.memory_space<vmem>>, %arg16: memref<3x8x32xf32, #tpu.memory_space<vmem>>) attributes {dimension_semantics = [], scalar_prefetch = 0 : i64, scratch_operands = 0 : i64, tpu.core_type = #tpu.core_type<tc>} {
    %c0 = arith.constant 0 : index
    %c0_0 = arith.constant 0 : index
    %0 = vector.load %arg0[%c0, %c0_0] : memref<8x16xf32, #tpu.memory_space<vmem>>, vector<8x16xf32>
    %c0_1 = arith.constant 0 : index
    %c0_2 = arith.constant 0 : index
    %1 = vector.load %arg3[%c0_1, %c0_2] : memref<16x128xf32, #tpu.memory_space<vmem>>, vector<16x128xf32>
    %c0_3 = arith.constant 0 : index
    %c0_4 = arith.constant 0 : index
    %2 = vector.load %arg4[%c0_3, %c0_4] : memref<32x128xf32, #tpu.memory_space<vmem>>, vector<32x128xf32>
    %c0_5 = arith.constant 0 : index
    %c0_6 = arith.constant 0 : index
    %3 = vector.load %arg5[%c0_5, %c0_6] : memref<1x128xf32, #tpu.memory_space<vmem>>, vector<1x128xf32>
    %c0_7 = arith.constant 0 : index
    %c0_8 = arith.constant 0 : index
    %c0_9 = arith.constant 0 : index
    %4 = vector.load %arg1[%c0_7, %c0_8, %c0_9] : memref<3x8x32xf32, #tpu.memory_space<vmem>>, vector<1x8x32xf32>
    %5 = vector.shape_cast %4 : vector<1x8x32xf32> to vector<8x32xf32>
    %c0_10 = arith.constant 0 : index
    %c0_11 = arith.constant 0 : index
    %c0_12 = arith.constant 0 : index
    %6 = vector.load %arg2[%c0_10, %c0_11, %c0_12] : memref<3x8x32xf32, #tpu.memory_space<vmem>>, vector<1x8x32xf32>
    %7 = vector.shape_cast %6 : vector<1x8x32xf32> to vector<8x32xf32>
    %cst = arith.constant dense<0.000000e+00> : vector<8x128xf32>
    %8 = tpu.matmul %0, %1, %cst {dimension_numbers = #tpu.dot_dimension_numbers<[1], [0], [0], [1], [0, 0, 1, 1], [], []>} : vector<8x16xf32>, vector<16x128xf32>, vector<8x128xf32> -> vector<8x128xf32>
    %cst_13 = arith.constant dense<0.000000e+00> : vector<8x128xf32>
    %9 = tpu.matmul %5, %2, %cst_13 {dimension_numbers = #tpu.dot_dimension_numbers<[1], [0], [0], [1], [0, 0, 1, 1], [], []>} : vector<8x32xf32>, vector<32x128xf32>, vector<8x128xf32> -> vector<8x128xf32>
    %10 = arith.addf %8, %9 : vector<8x128xf32>
    %11 = vector.broadcast %3 : vector<1x128xf32> to vector<8x128xf32>
    %12 = arith.addf %10, %11 : vector<8x128xf32>
    %13 = vector.extract_strided_slice %12 {offsets = [0, 0], sizes = [8, 32], strides = [1, 1]} : vector<8x128xf32> to vector<8x32xf32>
    %14 = arith.negf %13 : vector<8x32xf32>
    %15 = math.exp %14 : vector<8x32xf32>
    %cst_14 = arith.constant 1.000000e+00 : f32
    %16 = vector.broadcast %cst_14 : f32 to vector<8x32xf32>
    %17 = arith.addf %16, %15 : vector<8x32xf32>
    %18 = arith.divf %16, %17 : vector<8x32xf32>
    %19 = vector.extract_strided_slice %12 {offsets = [0, 32], sizes = [8, 32], strides = [1, 1]} : vector<8x128xf32> to vector<8x32xf32>
    %20 = arith.negf %19 : vector<8x32xf32>
    %21 = math.exp %20 : vector<8x32xf32>
    %cst_15 = arith.constant 1.000000e+00 : f32
    %22 = vector.broadcast %cst_15 : f32 to vector<8x32xf32>
    %23 = arith.addf %22, %21 : vector<8x32xf32>
    %24 = arith.divf %22, %23 : vector<8x32xf32>
    %25 = vector.extract_strided_slice %12 {offsets = [0, 64], sizes = [8, 32], strides = [1, 1]} : vector<8x128xf32> to vector<8x32xf32>
    %26 = math.tanh %25 : vector<8x32xf32>
    %27 = vector.extract_strided_slice %12 {offsets = [0, 96], sizes = [8, 32], strides = [1, 1]} : vector<8x128xf32> to vector<8x32xf32>
    %28 = arith.negf %27 : vector<8x32xf32>
    %29 = math.exp %28 : vector<8x32xf32>
    %cst_16 = arith.constant 1.000000e+00 : f32
    %30 = vector.broadcast %cst_16 : f32 to vector<8x32xf32>
    %31 = arith.addf %30, %29 : vector<8x32xf32>
    %32 = arith.divf %30, %31 : vector<8x32xf32>
    %33 = arith.mulf %24, %7 : vector<8x32xf32>
    %34 = arith.mulf %18, %26 : vector<8x32xf32>
    %35 = arith.addf %33, %34 : vector<8x32xf32>
    %36 = math.tanh %35 : vector<8x32xf32>
    %37 = arith.mulf %32, %36 : vector<8x32xf32>
    %c0_17 = arith.constant 0 : index
    %c0_18 = arith.constant 0 : index
    %c0_19 = arith.constant 0 : index
    %38 = vector.load %arg15[%c0_17, %c0_18, %c0_19] : memref<3x8x32xf32, #tpu.memory_space<vmem>>, vector<1x8x32xf32>
    %39 = vector.shape_cast %38 : vector<1x8x32xf32> to vector<8x32xf32>
    %40 = vector.shape_cast %37 : vector<8x32xf32> to vector<1x8x32xf32>
    tpu.vector_store %arg15[%c0_17, %c0_18, %c0_19], %40 {strides = array<i32>} : memref<3x8x32xf32, #tpu.memory_space<vmem>>, vector<1x8x32xf32>,
    %c0_20 = arith.constant 0 : index
    %c0_21 = arith.constant 0 : index
    %c0_22 = arith.constant 0 : index
    %41 = vector.load %arg16[%c0_20, %c0_21, %c0_22] : memref<3x8x32xf32, #tpu.memory_space<vmem>>, vector<1x8x32xf32>
    %42 = vector.shape_cast %41 : vector<1x8x32xf32> to vector<8x32xf32>
    %43 = vector.shape_cast %35 : vector<8x32xf32> to vector<1x8x32xf32>
    tpu.vector_store %arg16[%c0_20, %c0_21, %c0_22], %43 {strides = array<i32>} : memref<3x8x32xf32, #tpu.memory_space<vmem>>, vector<1x8x32xf32>,
    %c0_23 = arith.constant 0 : index
    %c0_24 = arith.constant 0 : index
    %44 = vector.load %arg6[%c0_23, %c0_24] : memref<32x128xf32, #tpu.memory_space<vmem>>, vector<32x128xf32>
    %c0_25 = arith.constant 0 : index
    %c0_26 = arith.constant 0 : index
    %45 = vector.load %arg7[%c0_25, %c0_26] : memref<32x128xf32, #tpu.memory_space<vmem>>, vector<32x128xf32>
    %c0_27 = arith.constant 0 : index
    %c0_28 = arith.constant 0 : index
    %46 = vector.load %arg8[%c0_27, %c0_28] : memref<1x128xf32, #tpu.memory_space<vmem>>, vector<1x128xf32>
    %cst_29 = arith.constant dense<0.000000e+00> : vector<8x128xf32>
    %47 = tpu.matmul %37, %44, %cst_29 {dimension_numbers = #tpu.dot_dimension_numbers<[1], [0], [0], [1], [0, 0, 1, 1], [], []>} : vector<8x32xf32>, vector<32x128xf32>, vector<8x128xf32> -> vector<8x128xf32>
    %cst_30 = arith.constant dense<0.000000e+00> : vector<8x128xf32>
    %48 = tpu.matmul %37, %45, %cst_30 {dimension_numbers = #tpu.dot_dimension_numbers<[1], [0], [0], [1], [0, 0, 1, 1], [], []>} : vector<8x32xf32>, vector<32x128xf32>, vector<8x128xf32> -> vector<8x128xf32>
    %49 = arith.addf %47, %48 : vector<8x128xf32>
    %50 = vector.broadcast %46 : vector<1x128xf32> to vector<8x128xf32>
    %51 = arith.addf %49, %50 : vector<8x128xf32>
    %52 = vector.extract_strided_slice %51 {offsets = [0, 0], sizes = [8, 32], strides = [1, 1]} : vector<8x128xf32> to vector<8x32xf32>
    %53 = arith.negf %52 : vector<8x32xf32>
    %54 = math.exp %53 : vector<8x32xf32>
    %cst_31 = arith.constant 1.000000e+00 : f32
    %55 = vector.broadcast %cst_31 : f32 to vector<8x32xf32>
    %56 = arith.addf %55, %54 : vector<8x32xf32>
    %57 = arith.divf %55, %56 : vector<8x32xf32>
    %58 = vector.extract_strided_slice %51 {offsets = [0, 32], sizes = [8, 32], strides = [1, 1]} : vector<8x128xf32> to vector<8x32xf32>
    %59 = arith.negf %58 : vector<8x32xf32>
    %60 = math.exp %59 : vector<8x32xf32>
    %cst_32 = arith.constant 1.000000e+00 : f32
    %61 = vector.broadcast %cst_32 : f32 to vector<8x32xf32>
    %62 = arith.addf %61, %60 : vector<8x32xf32>
    %63 = arith.divf %61, %62 : vector<8x32xf32>
    %64 = vector.extract_strided_slice %51 {offsets = [0, 64], sizes = [8, 32], strides = [1, 1]} : vector<8x128xf32> to vector<8x32xf32>
    %65 = math.tanh %64 : vector<8x32xf32>
    %66 = vector.extract_strided_slice %51 {offsets = [0, 96], sizes = [8, 32], strides = [1, 1]} : vector<8x128xf32> to vector<8x32xf32>
    %67 = arith.negf %66 : vector<8x32xf32>
    %68 = math.exp %67 : vector<8x32xf32>
    %cst_33 = arith.constant 1.000000e+00 : f32
    %69 = vector.broadcast %cst_33 : f32 to vector<8x32xf32>
    %70 = arith.addf %69, %68 : vector<8x32xf32>
    %71 = arith.divf %69, %70 : vector<8x32xf32>
    %72 = arith.mulf %63, %35 : vector<8x32xf32>
    %73 = arith.mulf %57, %65 : vector<8x32xf32>
    %74 = arith.addf %72, %73 : vector<8x32xf32>
    %75 = math.tanh %74 : vector<8x32xf32>
    %76 = arith.mulf %71, %75 : vector<8x32xf32>
    %c1 = arith.constant 1 : index
    %c0_34 = arith.constant 0 : index
    %c0_35 = arith.constant 0 : index
    %77 = vector.load %arg15[%c1, %c0_34, %c0_35] : memref<3x8x32xf32, #tpu.memory_space<vmem>>, vector<1x8x32xf32>
    %78 = vector.shape_cast %77 : vector<1x8x32xf32> to vector<8x32xf32>
    %79 = vector.shape_cast %76 : vector<8x32xf32> to vector<1x8x32xf32>
    tpu.vector_store %arg15[%c1, %c0_34, %c0_35], %79 {strides = array<i32>} : memref<3x8x32xf32, #tpu.memory_space<vmem>>, vector<1x8x32xf32>,
    %c1_36 = arith.constant 1 : index
    %c0_37 = arith.constant 0 : index
    %c0_38 = arith.constant 0 : index
    %80 = vector.load %arg16[%c1_36, %c0_37, %c0_38] : memref<3x8x32xf32, #tpu.memory_space<vmem>>, vector<1x8x32xf32>
    %81 = vector.shape_cast %80 : vector<1x8x32xf32> to vector<8x32xf32>
    %82 = vector.shape_cast %74 : vector<8x32xf32> to vector<1x8x32xf32>
    tpu.vector_store %arg16[%c1_36, %c0_37, %c0_38], %82 {strides = array<i32>} : memref<3x8x32xf32, #tpu.memory_space<vmem>>, vector<1x8x32xf32>,
    %c0_39 = arith.constant 0 : index
    %c0_40 = arith.constant 0 : index
    %83 = vector.load %arg9[%c0_39, %c0_40] : memref<32x128xf32, #tpu.memory_space<vmem>>, vector<32x128xf32>
    %c0_41 = arith.constant 0 : index
    %c0_42 = arith.constant 0 : index
    %84 = vector.load %arg10[%c0_41, %c0_42] : memref<32x128xf32, #tpu.memory_space<vmem>>, vector<32x128xf32>
    %c0_43 = arith.constant 0 : index
    %c0_44 = arith.constant 0 : index
    %85 = vector.load %arg11[%c0_43, %c0_44] : memref<1x128xf32, #tpu.memory_space<vmem>>, vector<1x128xf32>
    %cst_45 = arith.constant dense<0.000000e+00> : vector<8x128xf32>
    %86 = tpu.matmul %76, %83, %cst_45 {dimension_numbers = #tpu.dot_dimension_numbers<[1], [0], [0], [1], [0, 0, 1, 1], [], []>} : vector<8x32xf32>, vector<32x128xf32>, vector<8x128xf32> -> vector<8x128xf32>
    %cst_46 = arith.constant dense<0.000000e+00> : vector<8x128xf32>
    %87 = tpu.matmul %76, %84, %cst_46 {dimension_numbers = #tpu.dot_dimension_numbers<[1], [0], [0], [1], [0, 0, 1, 1], [], []>} : vector<8x32xf32>, vector<32x128xf32>, vector<8x128xf32> -> vector<8x128xf32>
    %88 = arith.addf %86, %87 : vector<8x128xf32>
    %89 = vector.broadcast %85 : vector<1x128xf32> to vector<8x128xf32>
    %90 = arith.addf %88, %89 : vector<8x128xf32>
    %91 = vector.extract_strided_slice %90 {offsets = [0, 0], sizes = [8, 32], strides = [1, 1]} : vector<8x128xf32> to vector<8x32xf32>
    %92 = arith.negf %91 : vector<8x32xf32>
    %93 = math.exp %92 : vector<8x32xf32>
    %cst_47 = arith.constant 1.000000e+00 : f32
    %94 = vector.broadcast %cst_47 : f32 to vector<8x32xf32>
    %95 = arith.addf %94, %93 : vector<8x32xf32>
    %96 = arith.divf %94, %95 : vector<8x32xf32>
    %97 = vector.extract_strided_slice %90 {offsets = [0, 32], sizes = [8, 32], strides = [1, 1]} : vector<8x128xf32> to vector<8x32xf32>
    %98 = arith.negf %97 : vector<8x32xf32>
    %99 = math.exp %98 : vector<8x32xf32>
    %cst_48 = arith.constant 1.000000e+00 : f32
    %100 = vector.broadcast %cst_48 : f32 to vector<8x32xf32>
    %101 = arith.addf %100, %99 : vector<8x32xf32>
    %102 = arith.divf %100, %101 : vector<8x32xf32>
    %103 = vector.extract_strided_slice %90 {offsets = [0, 64], sizes = [8, 32], strides = [1, 1]} : vector<8x128xf32> to vector<8x32xf32>
    %104 = math.tanh %103 : vector<8x32xf32>
    %105 = vector.extract_strided_slice %90 {offsets = [0, 96], sizes = [8, 32], strides = [1, 1]} : vector<8x128xf32> to vector<8x32xf32>
    %106 = arith.negf %105 : vector<8x32xf32>
    %107 = math.exp %106 : vector<8x32xf32>
    %cst_49 = arith.constant 1.000000e+00 : f32
    %108 = vector.broadcast %cst_49 : f32 to vector<8x32xf32>
    %109 = arith.addf %108, %107 : vector<8x32xf32>
    %110 = arith.divf %108, %109 : vector<8x32xf32>
    %111 = arith.mulf %102, %74 : vector<8x32xf32>
    %112 = arith.mulf %96, %104 : vector<8x32xf32>
    %113 = arith.addf %111, %112 : vector<8x32xf32>
    %114 = math.tanh %113 : vector<8x32xf32>
    %115 = arith.mulf %110, %114 : vector<8x32xf32>
    %c2 = arith.constant 2 : index
    %c0_50 = arith.constant 0 : index
    %c0_51 = arith.constant 0 : index
    %116 = vector.load %arg15[%c2, %c0_50, %c0_51] : memref<3x8x32xf32, #tpu.memory_space<vmem>>, vector<1x8x32xf32>
    %117 = vector.shape_cast %116 : vector<1x8x32xf32> to vector<8x32xf32>
    %118 = vector.shape_cast %115 : vector<8x32xf32> to vector<1x8x32xf32>
    tpu.vector_store %arg15[%c2, %c0_50, %c0_51], %118 {strides = array<i32>} : memref<3x8x32xf32, #tpu.memory_space<vmem>>, vector<1x8x32xf32>,
    %c2_52 = arith.constant 2 : index
    %c0_53 = arith.constant 0 : index
    %c0_54 = arith.constant 0 : index
    %119 = vector.load %arg16[%c2_52, %c0_53, %c0_54] : memref<3x8x32xf32, #tpu.memory_space<vmem>>, vector<1x8x32xf32>
    %120 = vector.shape_cast %119 : vector<1x8x32xf32> to vector<8x32xf32>
    %121 = vector.shape_cast %113 : vector<8x32xf32> to vector<1x8x32xf32>
    tpu.vector_store %arg16[%c2_52, %c0_53, %c0_54], %121 {strides = array<i32>} : memref<3x8x32xf32, #tpu.memory_space<vmem>>, vector<1x8x32xf32>,
    %c0_55 = arith.constant 0 : index
    %c0_56 = arith.constant 0 : index
    %122 = vector.load %arg12[%c0_55, %c0_56] : memref<32x4xf32, #tpu.memory_space<vmem>>, vector<32x4xf32>
    %cst_57 = arith.constant dense<0.000000e+00> : vector<8x4xf32>
    %123 = tpu.matmul %115, %122, %cst_57 {dimension_numbers = #tpu.dot_dimension_numbers<[1], [0], [0], [1], [0, 0, 1, 1], [], []>} : vector<8x32xf32>, vector<32x4xf32>, vector<8x4xf32> -> vector<8x4xf32>
    %c0_58 = arith.constant 0 : index
    %c0_59 = arith.constant 0 : index
    %124 = vector.load %arg13[%c0_58, %c0_59] : memref<1x4xf32, #tpu.memory_space<vmem>>, vector<1x4xf32>
    %125 = vector.broadcast %124 : vector<1x4xf32> to vector<8x4xf32>
    %126 = arith.addf %123, %125 : vector<8x4xf32>
    %c0_60 = arith.constant 0 : index
    %c0_61 = arith.constant 0 : index
    %127 = vector.load %arg14[%c0_60, %c0_61] : memref<8x4xf32, #tpu.memory_space<vmem>>, vector<8x4xf32>
    tpu.vector_store %arg14[%c0_60, %c0_61], %126 {strides = array<i32>} : memref<8x4xf32, #tpu.memory_space<vmem>>, vector<8x4xf32>,
    return
  }
}

</mosaic_0001>

<bundles_post_ra>
// kernel: tpu_custom_call.1
= control target key start
LH: loop header
LB: loop body
LE: loop exit
PB: predicated region body
PF: predicated region fallthrough
CT: control target
= control target key end

     0   :  { %s1625_s0 = inlined_call_operand.hbm [shape: f32[8,16], index: 0, kind: input, shape index: {}]   ;;  %s1626_s1 = inlined_call_operand.hbm [shape: f32[3,8,32], index: 1, kind: input, shape index: {}]   ;;  %s1627_s2 = inlined_call_operand.hbm [shape: f32[3,8,32], index: 2, kind: input, shape index: {}]   ;;  %s1628_s3 = inlined_call_operand.hbm [shape: f32[16,128], index: 3, kind: input, shape index: {}]   ;;  %s1629_s4 = inlined_call_operand.vmem [shape: f32[32,128], index: 4, kind: input, shape index: {}]   ;;  %s1630_s5 = inlined_call_operand.vmem [shape: f32[1,128], index: 5, kind: input, shape index: {}]   ;;  %s1631_s6 = inlined_call_operand.hbm [shape: f32[32,128], index: 6, kind: input, shape index: {}]   ;;  %s1632_s7 = inlined_call_operand.hbm [shape: f32[32,128], index: 7, kind: input, shape index: {}]   ;;  %s1633_s8 = inlined_call_operand.vmem [shape: f32[1,128], index: 8, kind: input, shape index: {}]   ;;  %s1634_s9 = inlined_call_operand.vmem [shape: f32[32,128], index: 9, kind: input, shape index: {}]   ;;  %s1635_s10 = inlined_call_operand.hbm [shape: f32[32,128], index: 10, kind: input, shape index: {}]   ;;  %s1636_s11 = inlined_call_operand.vmem [shape: f32[1,128], index: 11, kind: input, shape index: {}]   ;;  %s1637_s12 = inlined_call_operand.vmem [shape: f32[32,4], index: 12, kind: input, shape index: {}]   ;;  %s1638_s13 = inlined_call_operand.vmem [shape: f32[1,4], index: 13, kind: input, shape index: {}]   ;;  %s1639_s14 = inlined_call_operand.vmem [shape: f32[8,4], index: 14, kind: output, shape index: {0}]   ;;  %s1640_s15 = inlined_call_operand.hbm [shape: f32[3,8,32], index: 15, kind: output, shape index: {1}]   ;;  %s1641_s16 = inlined_call_operand.hbm [shape: f32[3,8,32], index: 16, kind: output, shape index: {2}]  }
   0x1   :  { %1643 = sst [smem:[#allocation23_spill]] %s1625_s0 }
   0x2   :  { %1644 = sst [smem:[#allocation24_spill]] %s1639_s14 }
   0x3   :  { %22 = vsyncpa [#allocation3], 0 }
   0x4   :  { %23 = vsyncpa [#allocation6], 0 }
   0x5   :  { %24 = vsyncpa [#allocation9], 0 }
   0x6   :  { %25 = vsyncpa [#allocation12], 0 }
   0x7   :  { %26 = vsyncpa [#allocation4], 0 }
   0x8   :  { %27 = vsyncpa [#allocation16], 0  ;;  %s1271_s21 = smov [#allocation5]   ;;  %s1061_s25 = scalar_lea.hbm %s1626_s1, 384 }
   0x9   :  { %s43_s22 = sshll.u32 %s1271_s21, 4  ;;  %p1062_p0 = scmp.ne.s32.totalorder %s1626_s1, %s1061_s25  ;;  %s44_s22 = int_to_ptr.vmem [resolvable:$true] %s43_s22 }
   0xa   :  { %p1065_p1 = scmp.lt.u32.totalorder %s1061_s25, %s1626_s1 }
   0xc   :  { %p1067_p2 = pnand %p1065_p1, %p1062_p0 }
   0xe   :  { %1070 = shalt.err (!%p1067_p2)
}
   0xf   :  { %s1071_s30 = scalar_lea.vmem %s44_s22, 384  ;;  %p1076_p4 = scmp.lt.s32.totalorder %s44_s22, %s44_s22 }
  0x10   :  { %p1072_p3 = scmp.ne.s32.totalorder %s44_s22, %s1071_s30  ;;  %p1077_p5 = scmp.lt.s32.totalorder %s1071_s30, %s1071_s30 }
  0x12   :  { %p1078_p6 = por %p1077_p5, %p1076_p4 }
  0x14   :  { %p1079_p7 = pnand %p1078_p6, %p1072_p3 }
  0x16   :  { %1082 = shalt.err (!%p1079_p7)
}
  0x17   :  { %s1272_s0 = smov 128   ;;  %s1273_s17 = smov 8  }
  0x18   :  { %49 = dma.hbm_to_vmem [thread:$0]  %s1626_s1, 384, %s44_s22, [#allocation6], %s1272_s0, %s1272_s0, %s1273_s17  }
  0x19   :  { %s1274_s20 = smov [#allocation8]   ;;  %s1275_s23 = smov [#allocation11]  }
  0x1a   :  { %s67_s21 = sshll.u32 %s1274_s20, 4  ;;  %s95_s24 = sshll.u32 %s1275_s23, 4  ;;  %s68_s21 = int_to_ptr.vmem [resolvable:$true] %s67_s21  ;;  %s96_s24 = int_to_ptr.vmem [resolvable:$true] %s95_s24 }
  0x1b   :  { %s1083_s27 = scalar_lea.hbm %s1628_s3, 256 }
  0x1c   :  { %p1084_p8 = scmp.ne.s32.totalorder %s1628_s3, %s1083_s27  ;;  %p1087_p9 = scmp.lt.u32.totalorder %s1083_s27, %s1628_s3 }
  0x1e   :  { %p1089_p10 = pnand %p1087_p9, %p1084_p8 }
  0x20   :  { %1092 = shalt.err (!%p1089_p10)
}
  0x21   :  { %s1093_s1 = scalar_lea.vmem %s68_s21, 256  ;;  %p1098_p12 = scmp.lt.s32.totalorder %s68_s21, %s68_s21 }
  0x22   :  { %p1094_p11 = scmp.ne.s32.totalorder %s68_s21, %s1093_s1  ;;  %p1099_p13 = scmp.lt.s32.totalorder %s1093_s1, %s1093_s1 }
  0x24   :  { %p1100_p0 = por %p1099_p13, %p1098_p12 }
  0x26   :  { %p1101_p1 = pnand %p1100_p0, %p1094_p11 }
  0x28   :  { %1104 = shalt.err (!%p1101_p1)
}
  0x29   :  { %73 = dma.hbm_to_vmem [thread:$0]  %s1628_s3, 256, %s68_s21, [#allocation9], %s1272_s0, %s1272_s0, %s1273_s17  }
  0x2a   :  { %s1105_s20 = scalar_lea.hbm %s1632_s7, 512 }
  0x2b   :  { %p1106_p2 = scmp.ne.s32.totalorder %s1632_s7, %s1105_s20  ;;  %p1109_p3 = scmp.lt.u32.totalorder %s1105_s20, %s1632_s7 }
  0x2d   :  { %p1111_p4 = pnand %p1109_p3, %p1106_p2 }
  0x2f   :  { %1114 = shalt.err (!%p1111_p4)
}
  0x30   :  { %s1115_s28 = scalar_lea.vmem %s96_s24, 512  ;;  %p1120_p6 = scmp.lt.s32.totalorder %s96_s24, %s96_s24 }
  0x31   :  { %p1116_p5 = scmp.ne.s32.totalorder %s96_s24, %s1115_s28  ;;  %p1121_p7 = scmp.lt.s32.totalorder %s1115_s28, %s1115_s28 }
  0x33   :  { %p1122_p8 = por %p1121_p7, %p1120_p6 }
  0x35   :  { %p1123_p9 = pnand %p1122_p8, %p1116_p5 }
  0x37   :  { %1126 = shalt.err (!%p1123_p9)
}
  0x38   :  { %101 = dma.hbm_to_vmem [thread:$0]  %s1632_s7, 512, %s96_s24, [#allocation12], %s1272_s0, %s1272_s0, %s1273_s17  }
  0x39   :  { %s1276_s29 = smov [#allocation2]   ;;  %s1277_s1 = smov [#allocation7]  }
  0x3a   :  { %s34_s30 = sshll.u32 %s1276_s29, 4  ;;  %s55_s22 = sshll.u32 %s1277_s1, 4  ;;  %s35_s30 = int_to_ptr.vmem [resolvable:$true] %s34_s30  ;;  %s56_s22 = int_to_ptr.vmem [resolvable:$true] %s55_s22 }
  0x3b   :  { %s1645_s14 = sld [smem:[#allocation23_spill]] }
  0x41   :  { %s1127_s20 = scalar_lea.hbm %s1645_s14, 128 }
  0x42   :  { %p1128_p10 = scmp.ne.s32.totalorder %s1645_s14, %s1127_s20  ;;  %p1131_p11 = scmp.lt.u32.totalorder %s1127_s20, %s1645_s14 }
  0x44   :  { %p1133_p12 = pnand %p1131_p11, %p1128_p10 }
  0x46   :  { %1136 = shalt.err (!%p1133_p12)
}
  0x47   :  { %s1137_s7 = scalar_lea.vmem %s35_s30, 128  ;;  %p1142_p0 = scmp.lt.s32.totalorder %s35_s30, %s35_s30 }
  0x48   :  { %p1138_p13 = scmp.ne.s32.totalorder %s35_s30, %s1137_s7  ;;  %p1143_p1 = scmp.lt.s32.totalorder %s1137_s7, %s1137_s7 }
  0x4a   :  { %p1144_p2 = por %p1143_p1, %p1142_p0 }
  0x4c   :  { %p1145_p3 = pnand %p1144_p2, %p1138_p13 }
  0x4e   :  { %1148 = shalt.err (!%p1145_p3)
}
  0x4f   :  { %37 = dma.hbm_to_vmem [thread:$0]  %s1645_s14, 128, %s35_s30, [#allocation3]  }
  0x50   :  { %s1149_s29 = scalar_lea.hbm %s1627_s2, 384 }
  0x51   :  { %p1150_p4 = scmp.ne.s32.totalorder %s1627_s2, %s1149_s29  ;;  %p1153_p5 = scmp.lt.u32.totalorder %s1149_s29, %s1627_s2 }
  0x53   :  { %p1155_p6 = pnand %p1153_p5, %p1150_p4 }
  0x55   :  { %1158 = shalt.err (!%p1155_p6)
}
  0x56   :  { %s1159_s23 = scalar_lea.vmem %s56_s22, 384  ;;  %p1164_p8 = scmp.lt.s32.totalorder %s56_s22, %s56_s22 }
  0x57   :  { %p1160_p7 = scmp.ne.s32.totalorder %s56_s22, %s1159_s23  ;;  %p1165_p9 = scmp.lt.s32.totalorder %s1159_s23, %s1159_s23 }
  0x59   :  { %p1166_p10 = por %p1165_p9, %p1164_p8 }
  0x5b   :  { %p1167_p11 = pnand %p1166_p10, %p1160_p7 }
  0x5d   :  { %1170 = shalt.err (!%p1167_p11)
}
  0x5e   :  { %61 = dma.hbm_to_vmem [thread:$0]  %s1627_s2, 384, %s56_s22, [#allocation6], %s1272_s0, %s1272_s0, %s1273_s17  }
  0x5f   :  { %s1278_s25 = smov [#allocation10]   ;;  %s1279_s27 = smov [#allocation13]  }
  0x60   :  { %s83_s26 = sshll.u32 %s1278_s25, 4  ;;  %s111_s7 = sshll.u32 %s1279_s27, 4  ;;  %s84_s26 = int_to_ptr.vmem [resolvable:$true] %s83_s26  ;;  %s112_s7 = int_to_ptr.vmem [resolvable:$true] %s111_s7 }
  0x61   :  { %s1171_s3 = scalar_lea.hbm %s1631_s6, 512 }
  0x62   :  { %p1172_p12 = scmp.ne.s32.totalorder %s1631_s6, %s1171_s3  ;;  %p1175_p13 = scmp.lt.u32.totalorder %s1171_s3, %s1631_s6 }
  0x64   :  { %p1177_p0 = pnand %p1175_p13, %p1172_p12 }
  0x66   :  { %1180 = shalt.err (!%p1177_p0)
}
  0x67   :  { %s1181_s2 = scalar_lea.vmem %s84_s26, 512  ;;  %p1186_p2 = scmp.lt.s32.totalorder %s84_s26, %s84_s26 }
  0x68   :  { %p1182_p1 = scmp.ne.s32.totalorder %s84_s26, %s1181_s2  ;;  %p1187_p3 = scmp.lt.s32.totalorder %s1181_s2, %s1181_s2 }
  0x6a   :  { %p1188_p4 = por %p1187_p3, %p1186_p2 }
  0x6c   :  { %p1189_p5 = pnand %p1188_p4, %p1182_p1 }
  0x6e   :  { %1192 = shalt.err (!%p1189_p5)
}
  0x6f   :  { %89 = dma.hbm_to_vmem [thread:$0]  %s1631_s6, 512, %s84_s26, [#allocation9], %s1272_s0, %s1272_s0, %s1273_s17  }
  0x70   :  { %s1193_s30 = scalar_lea.hbm %s1635_s10, 512 }
  0x71   :  { %p1194_p6 = scmp.ne.s32.totalorder %s1635_s10, %s1193_s30  ;;  %p1197_p7 = scmp.lt.u32.totalorder %s1193_s30, %s1635_s10 }
  0x73   :  { %p1199_p8 = pnand %p1197_p7, %p1194_p6 }
  0x75   :  { %1202 = shalt.err (!%p1199_p8)
}
  0x76   :  { %s1203_s28 = scalar_lea.vmem %s112_s7, 512  ;;  %p1208_p10 = scmp.lt.s32.totalorder %s112_s7, %s112_s7 }
  0x77   :  { %p1204_p9 = scmp.ne.s32.totalorder %s112_s7, %s1203_s28  ;;  %p1209_p11 = scmp.lt.s32.totalorder %s1203_s28, %s1203_s28 }
  0x79   :  { %p1210_p12 = por %p1209_p11, %p1208_p10 }
  0x7b   :  { %p1211_p13 = pnand %p1210_p12, %p1204_p9 }
  0x7d   :  { %1214 = shalt.err (!%p1211_p13)
}
  0x7e   :  { %117 = dma.hbm_to_vmem [thread:$0]  %s1635_s10, 512, %s112_s7, [#allocation12], %s1272_s0, %s1272_s0, %s1273_s17  }
  0x7f   :  { %1259 = dma.done.wait [#allocation3], 128  }
  0x80   :  { %1260 = vsyncadd [#allocation3], 4294967168 }
  0x81   :  { %1261 = dma.done.wait [#allocation6], 768  }
  0x82   :  { %1262 = vsyncadd [#allocation6], 4294966528 }
  0x83   :  { %1263 = dma.done.wait [#allocation9], 768  }
  0x84   :  { %1264 = vsyncadd [#allocation9], 4294966528 }
  0x85   :  { %1265 = dma.done.wait [#allocation12], 1024  }
  0x86   :  { %1266 = vsyncadd [#allocation12], 4294966272  ;;  %v1280_v0 = vmov 0.0|0.0   ;;  %vm1281_vm0 = vmmov 0   ;;  %v1282_v1 = vmov 0.0   ;;  %v148_v2 = vld [vmem:[%s1629_s4] sm:$0xff] }
  0x87   :  { %981 = vmatprep.subr.bf16.mxu0 %v1280_v0  ;;  %987 = vmatprep.subr.bf16.mxu1 %v1280_v0  ;;  %v149_v3 = vld [vmem:[%s1629_s4 + $0x8] sm:$0xff]  ;;  %v146_v4 = vld [vmem:[#allocation8] sm:$0xff]  ;;  %v147_v6 = vld [vmem:[#allocation8 + $0x8] sm:$0xff]  ;;  %vm229_vm1 = vcmask 130048   ;;  %vm155_vm2 = vcmask 261120   ;;  %s1283_s19 = smov 64  }
  0x88   :  { %923 = vmatprep.mubr.msk.f32.mxu1 %vm1281_vm0, %v1282_v1  ;;  %916 = vmatprep.mubr.msk.f32.mxu0 %vm1281_vm0, %v1282_v1  ;;  %v982_v5 = vpack.c.bf16 %v149_v3, %v148_v2  ;;  %v150_v7 = vld [vmem:[%s1629_s4 + $0x10] sm:$0xff]  ;;  %v151_v8 = vld [vmem:[%s1629_s4 + $0x18] sm:$0xff]  ;;  %v988_v9 = vpack.c.bf16 %v147_v6, %v146_v4  ;;  %v145_v11 = vld [vmem:[#allocation2] sm:$0xff]  ;;  %s1284_s20 = smov 32   ;;  %s1285_s2 = smov 96  }
  0x89   :  { %v985_v10 = vpack.c.bf16 %v151_v8, %v150_v7  ;;  %v153_v12 = vld [vmem:[#allocation5] sm:$0xff]  ;;  %v863_v15 = vld [vmem:[%s1630_s5] ss:$0 sm:$0xff]  ;;  %v353_v33 = vld [vmem:[#allocation11 + $0x8] sm:$0xff]  ;;  %s1287_s22 = smov [#allocation15]  }
  0x8a   :  { %983 = vmatpush3.bf16.msra.mxu0 %v982_v5  ;;  %989 = vmatpush3.bf16.msra.mxu1 %v988_v9  ;;  %v154_v21 = vld [vmem:[#allocation7] sm:$0xff]  ;;  %v352_v32 = vld [vmem:[#allocation11] sm:$0xff]  ;;  %v349_v36 = vld [vmem:[#allocation10 + $0x8] sm:$0xff] }
  0x8b   :  { %984 = vmatprep.subr.bf16.mxu0 %v1280_v0  ;;  %990 = vmatprep.subr.bf16.mxu1 %v1280_v0  ;;  %v348_v34 = vld [vmem:[#allocation10] sm:$0xff]  ;;  %v991_v35 = vpack.c.bf16 %v353_v33, %v352_v32  ;;  %v354_v37 = vld [vmem:[#allocation11 + $0x10] sm:$0xff]  ;;  %v355_v38 = vld [vmem:[#allocation11 + $0x18] sm:$0xff] }
  0x8c   :  { %v997_v39 = vpack.c.bf16 %v349_v36, %v348_v34  ;;  %v350_v40 = vld [vmem:[#allocation10 + $0x10] sm:$0xff]  ;;  %v351_v41 = vld [vmem:[#allocation10 + $0x18] sm:$0xff]  ;;  %v994_v42 = vpack.c.bf16 %v355_v38, %v354_v37  ;;  %v546_v3 = vld [vmem:[#allocation13] sm:$0xff] }
  0x8d   :  { %924 = vmatmul.mubr.msk.f32.vlgmr.msra.gmra.mrb[0].mxu1 %vm229_vm1, %v145_v11  ;;  %v1000_v43 = vpack.c.bf16 %v351_v41, %v350_v40  ;;  %v867_v49 = vld [vmem:[%s1633_s8] ss:$0 sm:$0xff]  ;;  %v547_v4 = vld [vmem:[#allocation13 + $0x8] sm:$0xff]  ;;  %v543_v7 = vld [vmem:[%s1634_s9 + $0x8] sm:$0xff] }
  0x8e   :  { %986 = vmatpush3.bf16.msra.mxu0 %v985_v10  ;;  %934 = vmatprep.mubr.msk.f32.mxu1 %vm1281_vm0, %v1282_v1  ;;  %v542_v5 = vld [vmem:[%s1634_s9] sm:$0xff]  ;;  %v1003_v6 = vpack.c.bf16 %v547_v4, %v546_v3  ;;  %v548_v8 = vld [vmem:[#allocation13 + $0x10] sm:$0xff]  ;;  %v544_v11 = vld [vmem:[%s1634_s9 + $0x10] sm:$0xff] }
  0x8f   :  { %996 = vmatprep.subr.bf16.mxu0 %v1280_v0  ;;  %992 = vmatpush3.bf16.msra.mxu1 %v991_v35  ;;  %v549_v9 = vld [vmem:[#allocation13 + $0x18] sm:$0xff]  ;;  %v1009_v10 = vpack.c.bf16 %v543_v7, %v542_v5  ;;  %v737_v37 = vld [vmem:[%s1637_s12 + $0x8] sm:$0xff]  ;;  %v738_v38 = vld [vmem:[%s1637_s12 + $0x10] sm:$0xff] }
  0x90   :  { %993 = vmatprep.subr.bf16.mxu1 %v1280_v0  ;;  %v736_v36 = vld [vmem:[%s1637_s12] sm:$0xff]  ;;  %v739_v40 = vld [vmem:[%s1637_s12 + $0x18] sm:$0xff]  ;;  %s1286_s12 = smov [#allocation14]  }
  0x91   :  { %917 = vmatmul.mubr.msk.f32.vlgmr.msra.gmra.mrb[0].mxu0 %vm155_vm2, %v153_v12  ;;  %v545_v12 = vld [vmem:[%s1634_s9 + $0x18] sm:$0xff]  ;;  %v1018_v41 = vpack.c.bf16 %v739_v40, %v738_v38  ;;  %s828_s4 = sshll.u32 %s1286_s12, 4  ;;  %s829_s4 = int_to_ptr.vmem [resolvable:$true] %s828_s4 }
  0x92   :  { %945 = vmatprep.mubr.msk.f32.mxu0 %vm1281_vm0, %v1282_v1  ;;  %998 = vmatpush3.bf16.msra.mxu0 %v997_v39  ;;  %v1015_v39 = vpack.c.bf16 %v737_v37, %v736_v36  ;;  %p1220_p1 = scmp.lt.s32.totalorder %s829_s4, %s829_s4 }
  0x93   :  { %999 = vmatprep.subr.bf16.mxu0 %v1280_v0  ;;  %995 = vmatpush3.bf16.msra.mxu1 %v994_v42 }
  0x94   :  { %1002 = vmatprep.subr.bf16.mxu1 %v1280_v0 }
  0x96   :  { %1001 = vmatpush3.bf16.msra.mxu0 %v1000_v43 }
  0x97   :  { %1008 = vmatprep.subr.bf16.mxu0 %v1280_v0 }
 0x160   :  { %v299_v13 = vpop.f32.mrb[0].mxu1 }
 0x161   :  { %v925_v14 = vpop.f32.mrb[1].mxu1 }
 0x162   :  { %v1012_v14 = vpack.c.bf16 %v545_v12, %v544_v11 }
 0x164   :  { %v225_v16 = vpop.f32.mrb[0].mxu0 }
 0x165   :  { %v300_v17 = vadd.f32 %v299_v13, %v225_v16  ;;  %v918_v18 = vpop.f32.mrb[1].mxu0  ;;  %v1006_v13 = vpack.c.bf16 %v549_v9, %v548_v8 }
 0x167   :  { %v309_v19 = vadd.f32 %v863_v15, %v300_v17 }
 0x169   :  { %1037 = vtanh.f32 %v309_v19  ;;  %v864_v22 = vmul.f32 -1.442695, %v309_v19 }
 0x16b   :  { %1039 = vpow2.f32 %v864_v22 }
 0x173   :  { %v1038_v20 = vpop.eup %1037 }
 0x174   :  { %323 = vrot.lane.b32.xlu0 %v1038_v20, %s1283_s19  ;;  %v871_v20 = vld [vmem:[%s1636_s11] ss:$0 sm:$0xff] }
 0x175   :  { %v1040_v23 = vpop.eup %1039 }
 0x176   :  { %v313_v24 = vadd.f32 1.0, %v1040_v23 }
 0x178   :  { %318 = vrot.lane.b32.xlu0 %v154_v21, %s1284_s20  ;;  %1041 = vrcp.f32 %v313_v24 }
 0x182   :  { %v1042_v25 = vpop.eup %1041 }
 0x1e6   :  { %v324_v26 = vpop.permute.xlu0 %323 }
 0x1e7   :  { %v326_v27 = vmul.f32 %v1042_v25, %v324_v26 }
 0x1e9   :  { %328 = vrot.lane.b32.xlu1 %v326_v27, %s1284_s20 }
 0x1ea   :  { %v319_v28 = vpop.permute.xlu0 %318 }
 0x1eb   :  { %v321_v29 = vmul.f32 %v1042_v25, %v319_v28 }
 0x25b   :  { %v329_v30 = vpop.permute.xlu1 %328 }
 0x25c   :  { %v1507_v31 = vadd.f32 %v329_v30, %v321_v29 }
 0x25e   :  { %1043 = vtanh.f32 %v1507_v31 }
 0x268   :  { %v1044_v44 = vpop.eup %1043 }
 0x269   :  { %334 = vrot.lane.b32.xlu1 %v1044_v44, %s1283_s19 }
 0x2db   :  { %v335_v45 = vpop.permute.xlu1 %334 }
 0x2dc   :  { %v337_v46 = vmul.f32 %v1042_v25, %v335_v45 }
 0x2de   :  { %339 = vrot.lane.b32.xlu0 %v337_v46, %s1284_s20 }
 0x350   :  { %v340_v47 = vpop.permute.xlu0 %339 }
 0x351   :  { %342 = vst.msk [vmem:[#allocation14] sm:$0xff] %vm155_vm2, %v340_v47  ;;  %935 = vmatmul.mubr.msk.f32.vlgmr.msra.gmra.mrb[2].mxu1 %vm155_vm2, %v340_v47  ;;  %946 = vmatmul.mubr.msk.f32.vlgmr.msra.gmra.mrb[2].mxu0 %vm155_vm2, %v340_v47 }
 0x352   :  { %956 = vmatprep.mubr.msk.f32.mxu1 %vm1281_vm0, %v1282_v1  ;;  %967 = vmatprep.mubr.msk.f32.mxu0 %vm1281_vm0, %v1282_v1 }
 0x353   :  { %1004 = vmatpush3.bf16.msra.mxu1 %v1003_v6  ;;  %1010 = vmatpush3.bf16.msra.mxu0 %v1009_v10 }
 0x354   :  { %1005 = vmatprep.subr.bf16.mxu1 %v1280_v0  ;;  %1011 = vmatprep.subr.bf16.mxu0 %v1280_v0 }
 0x357   :  { %1007 = vmatpush3.bf16.msra.mxu1 %v1006_v13  ;;  %1013 = vmatpush3.bf16.msra.mxu0 %v1012_v14 }
 0x358   :  { %1014 = vmatprep.subr.bf16.mxu1 %v1280_v0 }
 0x424   :  { %v425_v48 = vpop.f32.mrb[2].mxu1  ;;  %v495_v50 = vpop.f32.mrb[2].mxu0 }
 0x425   :  { %v496_v51 = vadd.f32 %v495_v50, %v425_v48  ;;  %v936_v52 = vpop.f32.mrb[3].mxu1  ;;  %v947_v53 = vpop.f32.mrb[3].mxu0 }
 0x427   :  { %v505_v54 = vadd.f32 %v867_v49, %v496_v51 }
 0x429   :  { %1045 = vtanh.f32 %v505_v54  ;;  %v868_v56 = vmul.f32 -1.442695, %v505_v54 }
 0x42b   :  { %1047 = vpow2.f32 %v868_v56 }
 0x433   :  { %v1046_v55 = vpop.eup %1045 }
 0x434   :  { %515 = vrot.lane.b32.xlu1 %v1046_v55, %s1283_s19 }
 0x435   :  { %v1048_v57 = vpop.eup %1047 }
 0x436   :  { %v509_v58 = vadd.f32 1.0, %v1048_v57 }
 0x438   :  { %1049 = vrcp.f32 %v509_v58 }
 0x442   :  { %v1050_v59 = vpop.eup %1049 }
 0x443   :  { %v513_v62 = vmul.f32 %v1050_v59, %v1507_v31 }
 0x4a6   :  { %v516_v60 = vpop.permute.xlu1 %515 }
 0x4a7   :  { %v518_v61 = vmul.f32 %v1050_v59, %v516_v60 }
 0x4a9   :  { %520 = vrot.lane.b32.xlu0 %v518_v61, %s1284_s20 }
 0x51b   :  { %v521_v63 = vpop.permute.xlu0 %520 }
 0x51c   :  { %v1529_v2 = vadd.f32 %v521_v63, %v513_v62 }
 0x51e   :  { %1051 = vtanh.f32 %v1529_v2 }
 0x528   :  { %v1052_v15 = vpop.eup %1051 }
 0x529   :  { %526 = vrot.lane.b32.xlu1 %v1052_v15, %s1283_s19 }
 0x59b   :  { %v527_v16 = vpop.permute.xlu1 %526 }
 0x59c   :  { %v529_v17 = vmul.f32 %v1050_v59, %v527_v16 }
 0x59e   :  { %531 = vrot.lane.b32.xlu0 %v529_v17, %s1284_s20 }
 0x610   :  { %v532_v18 = vpop.permute.xlu0 %531 }
 0x611   :  { %535 = vst.msk [vmem:[#allocation14 + $0x8] sm:$0xff] %vm155_vm2, %v532_v18  ;;  %957 = vmatmul.mubr.msk.f32.vlgmr.msra.gmra.mrb[4].mxu1 %vm155_vm2, %v532_v18  ;;  %968 = vmatmul.mubr.msk.f32.vlgmr.msra.gmra.mrb[4].mxu0 %vm155_vm2, %v532_v18 }
 0x612   :  { %978 = vmatprep.mubr.msk.f32.mxu1 %vm1281_vm0, %v1282_v1  ;;  %1016 = vmatpush3.bf16.msra.mxu1 %v1015_v39 }
 0x613   :  { %1017 = vmatprep.subr.bf16.mxu1 %v1280_v0 }
 0x616   :  { %1019 = vmatpush3.bf16.msra.mxu1 %v1018_v41 }
 0x6e4   :  { %v619_v19 = vpop.f32.mrb[4].mxu1  ;;  %v689_v21 = vpop.f32.mrb[4].mxu0 }
 0x6e5   :  { %v690_v22 = vadd.f32 %v689_v21, %v619_v19  ;;  %v958_v23 = vpop.f32.mrb[5].mxu1  ;;  %v969_v24 = vpop.f32.mrb[5].mxu0 }
 0x6e7   :  { %v699_v25 = vadd.f32 %v871_v20, %v690_v22 }
 0x6e9   :  { %1053 = vtanh.f32 %v699_v25  ;;  %v872_v27 = vmul.f32 -1.442695, %v699_v25 }
 0x6eb   :  { %1055 = vpow2.f32 %v872_v27 }
 0x6f3   :  { %v1054_v26 = vpop.eup %1053 }
 0x6f4   :  { %709 = vrot.lane.b32.xlu1 %v1054_v26, %s1283_s19 }
 0x6f5   :  { %v1056_v28 = vpop.eup %1055 }
 0x6f6   :  { %v703_v29 = vadd.f32 1.0, %v1056_v28 }
 0x6f8   :  { %1057 = vrcp.f32 %v703_v29 }
 0x702   :  { %v1058_v1 = vpop.eup %1057 }
 0x703   :  { %v707_v33 = vmul.f32 %v1058_v1, %v1529_v2 }
 0x766   :  { %v710_v30 = vpop.permute.xlu1 %709 }
 0x767   :  { %v712_v32 = vmul.f32 %v1058_v1, %v710_v30 }
 0x769   :  { %714 = vrot.lane.b32.xlu0 %v712_v32, %s1284_s20 }
 0x7db   :  { %v715_v34 = vpop.permute.xlu0 %714 }
 0x7dc   :  { %v717_v35 = vadd.f32 %v715_v34, %v707_v33 }
 0x7de   :  { %1059 = vtanh.f32 %v717_v35 }
 0x7e8   :  { %v1060_v42 = vpop.eup %1059 }
 0x7e9   :  { %720 = vrot.lane.b32.xlu1 %v1060_v42, %s1283_s19  ;;  %s840_s19 = sshll.u32 %s1287_s22, 4  ;;  %s1582_s19 = int_to_ptr.vmem [resolvable:$true] %s840_s19 }
 0x7ed   :  { %344 = vrot.lane.b32.xlu1 %v1507_v31, %s1285_s2 }
 0x7f1   :  { %731 = vrot.lane.b32.xlu1 %v717_v35, %s1285_s2 }
 0x85b   :  { %v721_v43 = vpop.permute.xlu1 %720 }
 0x85c   :  { %v723_v44 = vmul.f32 %v1058_v1, %v721_v43 }
 0x85e   :  { %725 = vrot.lane.b32.xlu0 %v723_v44, %s1284_s20  ;;  %s1215_s20 = scalar_lea.vmem %s829_s4, 384 }
 0x85f   :  { %v345_v45 = vpop.permute.xlu1 %344  ;;  %p1216_p0 = scmp.ne.s32.totalorder %s829_s4, %s1215_s20  ;;  %p1221_p2 = scmp.lt.s32.totalorder %s1215_s20, %s1215_s20 }
 0x860   :  { %347 = vst.msk [vmem:[#allocation15] sm:$0xff] %vm155_vm2, %v345_v45 }
 0x861   :  { %p1222_p3 = por %p1221_p2, %p1220_p1 }
 0x862   :  { %537 = vrot.lane.b32.xlu0 %v1529_v2, %s1285_s2 }
 0x863   :  { %v732_v46 = vpop.permute.xlu1 %731  ;;  %p1223_p4 = pnand %p1222_p3, %p1216_p0 }
 0x864   :  { %735 = vst.msk [vmem:[#allocation15 + $0x10] sm:$0xff] %vm155_vm2, %v732_v46 }
 0x8d0   :  { %v726_v0 = vpop.permute.xlu0 %725 }
 0x8d1   :  { %729 = vst.msk [vmem:[#allocation14 + $0x10] sm:$0xff] %vm155_vm2, %v726_v0  ;;  %979 = vmatmul.mubr.msk.f32.vlgmr.msra.gmra.mrb[6].mxu1 %vm155_vm2, %v726_v0 }
 0x8d4   :  { %v538_v47 = vpop.permute.xlu0 %537 }
 0x8d5   :  { %541 = vst.msk [vmem:[#allocation15 + $0x8] sm:$0xff] %vm155_vm2, %v538_v47 }
 0x8d6   :  { %1226 = shalt.err (!%p1223_p4)
}
 0x8d7   :  { %s1227_s8 = scalar_lea.hbm %s1640_s15, 384 }
 0x8d8   :  { %p1228_p5 = scmp.ne.s32.totalorder %s1640_s15, %s1227_s8  ;;  %p1231_p6 = scmp.lt.u32.totalorder %s1227_s8, %s1640_s15 }
 0x8da   :  { %p1233_p7 = pnand %p1231_p6, %p1228_p5 }
 0x8dc   :  { %1236 = shalt.err (!%p1233_p7)
}
 0x8dd   :  { %834 = dma.vmem_to_hbm [thread:$0]  %s829_s4, 384, %s1640_s15, [#allocation4], %s1272_s0, %s1272_s0, %s1273_s17  }
 0x8de   :  { %s1237_s6 = scalar_lea.vmem %s1582_s19, 384  ;;  %p1242_p9 = scmp.lt.s32.totalorder %s1582_s19, %s1582_s19 }
 0x8df   :  { %p1238_p8 = scmp.ne.s32.totalorder %s1582_s19, %s1237_s6  ;;  %p1243_p10 = scmp.lt.s32.totalorder %s1237_s6, %s1237_s6 }
 0x8e1   :  { %p1244_p11 = por %p1243_p10, %p1242_p9 }
 0x8e3   :  { %p1245_p12 = pnand %p1244_p11, %p1238_p8 }
 0x8e5   :  { %1248 = shalt.err (!%p1245_p12)
}
 0x8e6   :  { %s1249_s11 = scalar_lea.hbm %s1641_s16, 384 }
 0x8e7   :  { %p1250_p13 = scmp.ne.s32.totalorder %s1641_s16, %s1249_s11  ;;  %p1253_p0 = scmp.lt.u32.totalorder %s1249_s11, %s1641_s16 }
 0x8e9   :  { %p1255_p1 = pnand %p1253_p0, %p1250_p13 }
 0x8eb   :  { %1258 = shalt.err (!%p1255_p1)
}
 0x8ec   :  { %846 = dma.vmem_to_hbm [thread:$0]  %s1582_s19, 384, %s1641_s16, [#allocation16], %s1272_s0, %s1272_s0, %s1273_s17   ;;  %vm819_vm3 = vcmask 31744  }
 0x8ed   :  { %v873_v31 = vld [vmem:[%s1638_s13] ss:$0 sm:$0xff]  ;;  %s1646_s4 = sld [smem:[#allocation24_spill]] }
 0x9a4   :  { %v815_v48 = vpop.f32.mrb[6].mxu1 }
 0x9a5   :  { %v816_v49 = vadd.f32 %v873_v31, %v815_v48  ;;  %v980_v50 = vpop.f32.mrb[7].mxu1 }
 0x9a7   :  { %820 = vst.msk [vmem:[%s1646_s4] sm:$0xff] %vm819_vm3, %v816_v49 }
 0x9a8   :  { %1267 = dma.done.wait [#allocation4], 384  }
 0x9a9   :  { %1268 = vsyncadd [#allocation4], 4294966912 }
 0x9aa   :  { %1269 = dma.done.wait [#allocation16], 384  }
 0x9ab   :  { %1270 = vsyncadd [#allocation16], 4294966912 }
 0x9ac   :  { %855 = vsyncpa [#allocation3], 1 }
 0x9ad   :  { %856 = vsyncpa [#allocation6], 1 }
 0x9ae   :  { %857 = vsyncpa [#allocation9], 1 }
 0x9af   :  { %858 = vsyncpa [#allocation12], 1 }
 0x9b0   :  { %859 = vsyncpa [#allocation4], 1 }
 0x9b1   :  { %860 = vsyncpa [#allocation16], 1 }

</bundles_post_ra>
